<compile_context>
chip_gen: v7x
topology: tpu7x:2x2x1
jax: 0.10.0
libtpu: 0.0.40
codegen_flags: <defaults>
</compile_context>

<pallas_src>
import jax
import jax.numpy as jnp
from jax.experimental import pallas as pl
from jax.experimental.pallas import tpu as pltpu

_LANE = 128
# dtype-native sublane packing: 32-bit -> 8 rows, 16-bit -> 16, 8-bit -> 32.
_SUBLANE_BY_ITEMSIZE = {4: 8, 2: 16, 1: 32}
# ~6 MiB per block per operand (tile_rows * 128 lanes * itemsize). With the
# default double-buffered BlockSpec pipeline this is ~24 MiB resident.
_BLOCK_BYTES = 6 * 1024 * 1024
# Explicit scoped-VMEM request: covers 4x block + compiler scratch. Needed on
# v5e (16 MiB scoped default); safe on v6e (32/128) and v7x (32/64).
_VMEM_LIMIT_BYTES = 30 * 1024 * 1024
# Below this, pallas_call fixed overhead beats any pipelining win; use XLA.
_MIN_PALLAS_BYTES = 256 * 1024
# Ensure at least this many grid steps so v7x's two TensorCores both get work.
_MIN_GRID_STEPS = 2


def _sign_where(x: jax.Array) -> jax.Array:
    one = jnp.ones_like(x)
    return jnp.where(x >= 0, one, -one)


def _ste_sign_kernel(x_ref, o_ref):
    x = x_ref[...]
    one = jnp.ones_like(x)
    o_ref[...] = jnp.where(x >= 0, one, -one)


def ste_sign(
    x: jax.Array,
    clip_value: float = 1.0,
    *,
    donate: bool = False,
    min_pallas_bytes: int = _MIN_PALLAS_BYTES,
) -> jax.Array:
    """Elementwise sign(x) (>=0 -> +1, else -1) as one streaming Pallas kernel."""
    del clip_value  # backward-only parameter; forward pass does not use it
    orig_shape = x.shape
    dtype = x.dtype
    n = x.size
    if n == 0:
        return x

    itemsize = jnp.dtype(dtype).itemsize
    sub = _SUBLANE_BY_ITEMSIZE.get(itemsize, 8)
    nbytes = n * itemsize

    # Tiny-input fast path: custom-call dispatch + pipeline prologue dominate
    # below a few hundred KiB; a fused XLA where() is faster.
    if nbytes < min_pallas_bytes:
        return _sign_where(x)

    # Ragged fallback (size not a multiple of 128 lanes, or fewer rows than a
    # sublane group): one fused XLA pass is already at HBM roofline, whereas
    # any pad/slice/concat around the Pallas kernel adds full-array passes.
    # TODO(synk): manual-DMA path (memory_space=pl.ANY + SMEM length scalar)
    # if a pure-Pallas ragged path is ever required.
    if n % _LANE != 0 or (n // _LANE) < sub:
        return _sign_where(x)

    rows = n // _LANE
    x2d = jnp.ravel(x).reshape(rows, _LANE)  # contiguous reshape: zero-copy

    # Block sizing: as large as ~6 MiB per operand, but split into at least
    # _MIN_GRID_STEPS steps (rounded up to a sublane multiple) so the
    # "parallel" grid axis actually feeds both TensorCores on v7x.
    max_tile_rows = _BLOCK_BYTES // (_LANE * itemsize)      # multiple of `sub`
    target_rows = -(-rows // _MIN_GRID_STEPS)               # cdiv(rows, steps)
    target_rows = -(-target_rows // sub) * sub              # round up to sublane
    tile_rows = max(sub, min(max_tile_rows, target_rows))
    grid = (pl.cdiv(rows, tile_rows),)                      # masked tail block if partial

    out2d = pl.pallas_call(
        _ste_sign_kernel,
        out_shape=jax.ShapeDtypeStruct((rows, _LANE), dtype),
        grid_spec=pltpu.PrefetchScalarGridSpec(
            num_scalar_prefetch=0,
            grid=grid,
            in_specs=[pl.BlockSpec((tile_rows, _LANE), lambda i: (i, 0))],
            out_specs=pl.BlockSpec((tile_rows, _LANE), lambda i: (i, 0)),
        ),
        compiler_params=pltpu.CompilerParams(
            # Shards the streaming grid across both TensorCores on v7x;
            # no-op on single-TC v5e/v6e.
            dimension_semantics=("parallel",),
            vmem_limit_bytes=_VMEM_LIMIT_BYTES,
        ),
        # Advisory: lets XLA schedule surrounding ops around a known
        # memory-bound custom call.
        cost_estimate=pl.CostEstimate(
            flops=n, transcendentals=0, bytes_accessed=2 * n * itemsize
        ),
        # Optionally reuse the input HBM buffer for the output (only safe if
        # the caller no longer needs x; only effective on this aligned path).
        input_output_aliases=({0: 0} if donate else {}),
    )(x2d)

    return out2d.reshape(orig_shape)


class STESign:
    """JAX/Pallas port of quantorch STESign (forward only)."""

    def __init__(self, clip_value: float = 1.0):
        self.clip_value = clip_value

    def __call__(self, x: jax.Array) -> jax.Array:
        return ste_sign(x, self.clip_value)


if __name__ == "__main__":
    key = jax.random.PRNGKey(0)
    mod = STESign(clip_value=1.0)

    # Module call on small NCHW activations (takes the tiny-input fast path).
    x = jax.random.normal(key, (2, 4, 16, 16), dtype=jnp.float32)
    y = jax.block_until_ready(mod(x))
    assert y.shape == x.shape and y.dtype == x.dtype
    assert bool(jnp.all(y == _sign_where(x)))

    # Force the Pallas kernel on the same small shape (2-step parallel grid).
    y_k = jax.block_until_ready(ste_sign(x, min_pallas_bytes=0))
    assert y_k.shape == x.shape and y_k.dtype == x.dtype
    assert bool(jnp.all(y_k == _sign_where(x)))

    # Masked-tail grid block: rows (=20) is not a multiple of tile_rows (=16).
    x_m = jax.random.normal(jax.random.PRNGKey(1), (2, 5, 16, 16), dtype=jnp.float32)
    y_m = jax.block_until_ready(ste_sign(x_m, min_pallas_bytes=0))
    assert y_m.shape == x_m.shape and y_m.dtype == x_m.dtype
    assert bool(jnp.all(y_m == _sign_where(x_m)))

    # bf16 path (dtype-aware sublane rounding: 16-row multiples).
    x_b = jax.random.normal(jax.random.PRNGKey(2), (2, 4, 16, 16), dtype=jnp.bfloat16)
    y_b = jax.block_until_ready(ste_sign(x_b, min_pallas_bytes=0))
    assert y_b.shape == x_b.shape and y_b.dtype == x_b.dtype
    assert bool(jnp.all(y_b == _sign_where(x_b)))

    # Ragged sizes (n % 128 != 0) use the single-pass fused XLA fallback.
    x_r = jax.random.normal(jax.random.PRNGKey(3), (3, 5, 7), dtype=jnp.float32)
    y_r = jax.block_until_ready(ste_sign(x_r))
    assert y_r.shape == x_r.shape and y_r.dtype == x_r.dtype
    assert bool(jnp.all(y_r == _sign_where(x_r)))

    print("KERNEL_OK")
</pallas_src>

<mosaic_0001>
module attributes {stable_mosaic.version = 11 : i64} {
  func.func @_ste_sign_kernel(%arg0: i32, %arg1: memref<8x128xf32, #tpu.memory_space<vmem>>, %arg2: memref<8x128xf32, #tpu.memory_space<vmem>>) attributes {dimension_semantics = [#tpu.dimension_semantics<parallel>], iteration_bounds = array<i64: 2>, scalar_prefetch = 0 : i64, scratch_operands = 0 : i64, tpu.core_type = #tpu.core_type<tc>, window_params = [{transform_indices = @transform_0, window_bounds = array<i64: 8, 128>}, {transform_indices = @transform_1, window_bounds = array<i64: 8, 128>}]} {
    %c0 = arith.constant 0 : index
    %c0_0 = arith.constant 0 : index
    %0 = vector.load %arg1[%c0, %c0_0] : memref<8x128xf32, #tpu.memory_space<vmem>>, vector<8x128xf32>
    %cst = arith.constant 1.000000e+00 : f32
    %1 = vector.broadcast %cst : f32 to vector<8x128xf32>
    %cst_1 = arith.constant 0.000000e+00 : f32
    %2 = vector.broadcast %cst_1 : f32 to vector<8x128xf32>
    %3 = arith.cmpf oge, %0, %2 : vector<8x128xf32>
    %cst_2 = arith.constant 0.000000e+00 : f32
    %4 = vector.broadcast %cst_2 : f32 to vector<8x128xf32>
    %5 = arith.subf %4, %1 : vector<8x128xf32>
    %6 = arith.select %3, %1, %5 : vector<8x128xi1>, vector<8x128xf32>
    %c0_3 = arith.constant 0 : index
    %c0_4 = arith.constant 0 : index
    %7 = vector.load %arg2[%c0_3, %c0_4] : memref<8x128xf32, #tpu.memory_space<vmem>>, vector<8x128xf32>
    tpu.vector_store %arg2[%c0_3, %c0_4], %6 {strides = array<i32>} : memref<8x128xf32, #tpu.memory_space<vmem>>, vector<8x128xf32>,
    return
  }
  func.func @transform_0(%arg0: i32) -> (i32, i32) {
    %c0_i32 = arith.constant 0 : i32
    %c0_i32_0 = arith.constant 0 : i32
    return %arg0, %c0_i32 : i32, i32
  }
  func.func @transform_1(%arg0: i32) -> (i32, i32) {
    %c0_i32 = arith.constant 0 : i32
    %c0_i32_0 = arith.constant 0 : i32
    return %arg0, %c0_i32 : i32, i32
  }
}

</mosaic_0001>

<bundles_post_ra>
// kernel: tpu_custom_call.1
= control target key start
LH: loop header
LB: loop body
LE: loop exit
PB: predicated region body
PF: predicated region fallthrough
CT: control target
= control target key end

     0   :  { %6 = vsyncpa [#allocation3], 0  ;;  %s551_s0 = inlined_call_operand.hbm [shape: f32[16,128], index: 0, kind: input, shape index: {}]   ;;  %s552_s1 = inlined_call_operand.hbm [shape: f32[16,128], index: 1, kind: output, shape index: {}]  }
   0x1   :  { %8 = vsyncpa [#allocation3 + $0x1], 0 }
   0x2   :  { %9 = vsyncpa [#allocation4], 0 }
   0x3   :  { %11 = vsyncpa [#allocation4 + $0x1], 0  ;;  %s390_s6 = smov 0   ;;  %s392_s7 = smov 0  }
   0x4   :  { %s394_s8 = smov 0   ;;  %s396_s9 = smov 0  }
   0x5 LB: > { %s411_s10 = sadd.s32 4294967295, %s375_s9   ;;  %s220_s11 = sadd.s32 4294967294, %s375_s9   ;;  %s375_s9 = sphi %s396_s9, %s567_s9   ;;  %s371_s8 = sphi %s394_s8, %s566_s8   ;;  %s367_s7 = sphi %s392_s7, %s565_s7   ;;  %s363_s6 = sphi %s390_s6, %s564_s6  }
   0x6   : > { %s415_s12 = sadd.s32 1, %s375_s9   ;;  %s24_s13 = sadd.s32 1, %s371_s8 }
   0x7   : > { %s21_s14 = ssub.s32 %s375_s9, %s415_s12  ;;  %p31_p0 = scmp.ne.s32.totalorder %s371_s8, %s367_s7 }
   0x8   : > { %p22_p1 = scmp.eq.s32.totalorder %s21_s14, 0  ;;  %p32_p2 = scmp.eq.s32.totalorder %s375_s9, 0 }
   0x9   : > { %p37_p3 = scmp.ne.s32.totalorder %s367_s7, %s363_s6  ;;  %p38_p4 = scmp.eq.s32.totalorder %s411_s10, 0 }
   0xa   : > { %s427_s15 = scalar_select %p22_p1, %s371_s8, %s24_s13  }
   0xb   : > { %p429_p5 = por %p32_p2, %p31_p0  ;;  %p433_p6 = por %p38_p4, %p37_p3 }
   0xc   : > { %p61_p7 = scmp.eq.s32.totalorder %s411_s10, 1  ;;  %p67_p8 = scmp.eq.s32.totalorder %s220_s11, 1 }
   0xd   : > { %p244_p10 = scmp.lt.s32.totalorder %s375_s9, 2  ;;  %s87_s20 = sand.u32 1, %s371_s8  }
   0xe   : > { %p440_p11 = por %p61_p7, %p31_p0  ;;  %p444_p12 = por %p67_p8, %p37_p3 }
   0xf   : > { %s224_s21 = sshll.u32 %s375_s9, 7  ;;  %s223_s22 = sshll.u32 %s87_s20, 3 }
  0x10   : > { %s556_s18 = scalar_select %p440_p11, 1, 0 }
  0x11   : > { %s557_s19 = scalar_select %p444_p12, 1, 0 }
  0x12   : > { %s453_s25 = scalar_lea.hbm %s551_s0, %s224_s21  ;;  %s91_s26 = scalar_lea.vmem [#allocation2], %s223_s22 }
  0x13   : > { %s98_s27 = sshll.u32 %s91_s26, 4  ;;  %p457_p13 = pnand %p244_p10, %p429_p5  ;;  %s461_s27 = int_to_ptr.vmem [resolvable:$true] %s98_s27 }
  0x14   : > { %s88_s29 = scalar_lea.sflag [#allocation3], %s87_s20  ;;  %s279_s30 = scalar_lea.hbm %s453_s25, 128 }
  0x15   : > { %p280_p2 = scmp.ne.s32.totalorder %s453_s25, %s279_s30  ;;  %p281_p3 = pneg %p457_p13 }
  0x16   : > { %s284_s4 = scalar_lea.hbm %s551_s0, 256  ;;  %p285_p5 = scmp.lt.u32.totalorder %s453_s25, %s551_s0 }
  0x17   : > { %p282_p4 = pnand %p281_p3, %p280_p2  ;;  %p286_p8 = scmp.lt.u32.totalorder %s284_s4, %s279_s30 }
  0x18   : > { %p288_p9 = scmp.lt.u32.totalorder %s279_s30, %s453_s25 }
  0x19   : > { %p283_p7 = pneg %p282_p4  ;;  %p287_p10 = por %p286_p8, %p285_p5 }
  0x1b   : > { %p289_p0 = por %p288_p9, %p287_p10 }
  0x1d   : > { %p290_p1 = pnand %p289_p0, %p283_p7 }
  0x1f   : > { %293 = shalt.err (!%p290_p1)
}
  0x20   : > { %s294_s13 = scalar_lea.vmem %s461_s27, 128  ;;  %s377_s14 = smov [#allocation2]  }
  0x21   : > { %p295_p2 = scmp.ne.s32.totalorder %s461_s27, %s294_s13  ;;  %s299_s16 = sshll.u32 %s377_s14, 4  ;;  %s300_s16 = int_to_ptr.vmem [resolvable:$false] %s299_s16 }
  0x22   : > { %s301_s20 = scalar_lea.vmem %s300_s16, 256  ;;  %p302_p11 = scmp.lt.s32.totalorder %s461_s27, %s300_s16 }
  0x23   : > { %p297_p4 = pnand %p295_p2, %p281_p3  ;;  %p303_p5 = scmp.lt.s32.totalorder %s301_s20, %s294_s13 }
  0x25   : > { %p298_p12 = pneg %p297_p4  ;;  %p304_p8 = por %p303_p5, %p302_p11 }
  0x27   : > { %p305_p9 = pnand %p304_p8, %p298_p12 }
  0x29   : > { %308 = shalt.err (!%p305_p9)
}
  0x2a   : > { %239 = dma.hbm_to_vmem [thread:$0]  (!%p457_p13), %s453_s25, 128, %s461_s27, %s88_s29  }
  0x2b   : > { %p559_p0 = scmp.lt.s32.totalorder %s375_s9, 3  ;;  %p560_p1 = scmp.ge.s32.totalorder %s375_s9, 1 }
  0x2d   : > { %p104_p3 = pnand %p560_p1, %p559_p0 }
  0x2e   : > { %s495_s21 = sand.u32 (!%p104_p3), 1, %s367_s7  }
  0x2f   : > { %107 = sbr.rel (%p104_p3) target bundleno = 81 (0x51), region = 24  ;;  %s226_s22 = sshll.u32 (!%p104_p3), %s495_s21, 3 }
  0x30   : > { %s110_s23 = scalar_lea.sflag (!%p104_p3), [#allocation3], %s495_s21  ;;  %s113_s24 = scalar_lea.vmem (!%p104_p3), [#allocation2], %s226_s22 }
  0x36   : > { %354 = dma.done.wait (%p433_p6), %s110_s23, 128  }
  0x37   : > { %356 = vsyncadd (%p433_p6), %s110_s23, 4294967168  ;;  %s131_s25 = scalar_lea.vmem [#allocation5], %s226_s22  ;;  %s229_s27 = sshll.u32 %s411_s10, 7  ;;  %v132_v0 = vld [vmem:[%s113_s24] sm:$0xff]  ;;  %v378_v1 = vmov -1.0  }
  0x38   : > { %s150_s26 = sshll.u32 %s131_s25, 4  ;;  %vm133_vm0 = vcmp.ge.f32.partialorder %v132_v0, 0.0  ;;  %s509_s30 = scalar_lea.hbm %s552_s1, %s229_s27  ;;  %s504_s26 = int_to_ptr.vmem [resolvable:$true] %s150_s26 }
  0x39   : > { %v134_v2 = vsel %vm133_vm0, 1.0, %v378_v1  ;;  %s137_s17 = scalar_lea.sflag [#allocation4], %s495_s21  ;;  %s309_s2 = scalar_lea.vmem %s504_s26, 128 }
  0x3a   : > { %135 = vst [vmem:[%s131_s25] sm:$0xff] %v134_v2  ;;  %p310_p6 = scmp.ne.s32.totalorder %s504_s26, %s309_s2  ;;  %p561_p11 = scmp.ne.s32.totalorder %s556_s18, 0 }
  0x3b   : > { %s379_s10 = smov [#allocation5]  }
  0x3c   : > { %p311_p12 = pnand %p310_p6, %p561_p11  ;;  %s313_s3 = sshll.u32 %s379_s10, 4  ;;  %s314_s3 = int_to_ptr.vmem [resolvable:$false] %s313_s3 }
  0x3d   : > { %s315_s4 = scalar_lea.vmem %s314_s3, 256  ;;  %p316_p7 = scmp.lt.s32.totalorder %s504_s26, %s314_s3 }
  0x3e   : > { %p312_p13 = pneg %p311_p12  ;;  %p317_p10 = scmp.lt.s32.totalorder %s315_s4, %s309_s2 }
  0x40   : > { %p318_p2 = por %p317_p10, %p316_p7 }
  0x42   : > { %p319_p4 = pnand %p318_p2, %p312_p13 }
  0x44   : > { %322 = shalt.err (!%p319_p4)
}
  0x45   : > { %s323_s5 = scalar_lea.hbm %s509_s30, 128  ;;  %s327_s14 = scalar_lea.hbm %s552_s1, 256 }
  0x46   : > { %p324_p5 = scmp.ne.s32.totalorder %s509_s30, %s323_s5  ;;  %p328_p0 = scmp.lt.u32.totalorder %s509_s30, %s552_s1 }
  0x47   : > { %p329_p1 = scmp.lt.u32.totalorder %s327_s14, %s323_s5  ;;  %p331_p6 = scmp.lt.u32.totalorder %s323_s5, %s509_s30 }
  0x48   : > { %p325_p8 = pnand %p324_p5, %p561_p11 }
  0x49   : > { %p330_p3 = por %p329_p1, %p328_p0 }
  0x4a   : > { %p326_p9 = pneg %p325_p8 }
  0x4b   : > { %p332_p12 = por %p331_p6, %p330_p3 }
  0x4d   : > { %p333_p13 = pnand %p332_p12, %p326_p9 }
  0x4f   : > { %336 = shalt.err (!%p333_p13)
}
  0x50   : > { %234 = dma.vmem_to_hbm [thread:$0]  (%p561_p11), %s504_s26, 128, %s509_s30, %s137_s17  }
  0x51 PF: > { %s162_s21 = sand.u32 1, %s363_s6   ;;  %p562_p7 = scmp.ne.s32.totalorder %s557_s19, 0 }
  0x52   : > { %p563_p10 = scmp.ge.s32.totalorder %s375_s9, 2  ;;  %s163_s22 = scalar_lea.sflag [#allocation4], %s162_s21 }
  0x54   : > { %p241_p2 = pnand %p563_p10, %p562_p7 }
  0x56   : > { %358 = dma.done.wait (!%p241_p2), %s163_s22, 128  }
  0x57   : > { %360 = vsyncadd (!%p241_p2), %s163_s22, 4294967168  ;;  %p14_p4 = scmp.ge.s32.totalorder %s415_s12, 4   ;;  %s564_s6 = smov %s367_s7 }
  0x58   : > { %s565_s7 = smov %s371_s8  ;;  %s566_s8 = smov %s427_s15 }
  0x59   : > { %s567_s9 = smov %s415_s12  ;;  %16 = sbr.rel (!%p14_p4) target bundleno = 5 (0x5), region = 69 }
  0x60   :  { %168 = vsyncpa [#allocation3], 1 }
  0x61   :  { %170 = vsyncpa [#allocation3 + $0x1], 1 }
  0x62   :  { %171 = vsyncpa [#allocation4], 1 }
  0x63   :  { %173 = vsyncpa [#allocation4 + $0x1], 1 }

</bundles_post_ra>
